<compile_context>
chip_gen: v6e
topology: v6e:2x2x1
jax: 0.10.0
libtpu: 0.0.40
codegen_flags: <defaults>
</compile_context>

<pallas_src>
import jax
import jax.numpy as jnp
from jax.experimental import pallas as pl
from jax.experimental.pallas import tpu as pltpu

LANE = 128
VMEM_BLOCK_BUDGET = 8 << 20   # target bytes for the double-buffered x/out blocks


def _round_up(v, m):
    return ((v + m - 1) // m) * m


def _pool_sum_kernel(x_ref, o_ref):
    # x_ref: (1, Cp, hw_tile) in x's native dtype; o_ref: (1, Cp, 1) f32 accumulator.
    @pl.when(pl.program_id(1) == 0)
    def _():
        o_ref[...] = jnp.zeros_like(o_ref)

    # Accumulate the spatial sum in f32 without materializing an f32 copy of x.
    o_ref[...] += jnp.sum(x_ref[...], axis=2, keepdims=True, dtype=jnp.float32)


def _attn_kernel(pooled_ref, wt_ref, b_ref, o_ref):
    # pooled_ref: (N, Cp) f32 channel means; wt_ref: (Cp, Cp) = W^T; b_ref: (1, Cp).
    # 1x1 Conv2d(C, C, bias=True) on the pooled vector == pooled @ W^T + b.
    y = jnp.dot(pooled_ref[...], wt_ref[...],
                preferred_element_type=jnp.float32) + b_ref[...]
    o_ref[...] = jax.nn.sigmoid(y)


def _scale_kernel(a_ref, x_ref, o_ref):
    # a_ref: (1, Cp, 1) attention in x's dtype; x_ref/o_ref: (1, Cp, hw_tile).
    o_ref[...] = x_ref[...] * a_ref[...]


def channel_attention(x, conv_weight, conv_bias):
    """x: (N, C, H, W), conv_weight: (C, C, 1, 1), conv_bias: (C,)."""
    n, c, h, w = x.shape
    hw = h * w
    itemsize = jnp.dtype(x.dtype).itemsize

    # Sublane-dense channel padding (8 for f32, 16 for bf16, 32 for int8).
    sub = 8 * max(1, 4 // itemsize)
    c_pad = _round_up(c, sub)

    # Lane-dense HW tile (multiple of 128) sized so the scale kernel's
    # double-buffered in + out blocks fit the VMEM budget on every generation.
    max_tile = (VMEM_BLOCK_BUDGET // (4 * c_pad * itemsize)) // LANE * LANE
    hw_tile = min(_round_up(hw, LANE), max(max_tile, LANE))
    hw_pad = _round_up(hw, hw_tile)
    n_tiles = hw_pad // hw_tile

    block_bytes = c_pad * hw_tile * itemsize
    vmem_limit = int(4 * block_bytes * 1.25) + (2 << 20)
    vmem_limit = min(max(vmem_limit, 8 << 20), 48 << 20)

    # Zero-pad x / weights (padded channels & positions are sliced away at the end;
    # zeros contribute nothing to the pooled sums).
    x2 = x.reshape(n, c, hw)
    if c_pad != c or hw_pad != hw:
        x2 = jnp.pad(x2, ((0, 0), (0, c_pad - c), (0, hw_pad - hw)))
    w2 = conv_weight.reshape(c, c).astype(jnp.float32)
    if c_pad != c:
        w2 = jnp.pad(w2, ((0, c_pad - c), (0, c_pad - c)))
    wt = w2.T                                              # (Cin_p, Cout_p)
    b2 = conv_bias.astype(jnp.float32).reshape(1, c)
    if c_pad != c:
        b2 = jnp.pad(b2, ((0, 0), (0, c_pad - c)))

    # ---- pass 1: global average pool (streaming reduction, f32 accumulate) ----
    pooled_sum = pl.pallas_call(
        _pool_sum_kernel,
        out_shape=jax.ShapeDtypeStruct((n, c_pad, 1), jnp.float32),
        grid_spec=pltpu.PrefetchScalarGridSpec(
            num_scalar_prefetch=0,
            grid=(n, n_tiles),
            in_specs=[pl.BlockSpec((1, c_pad, hw_tile), lambda b, t: (b, 0, t))],
            out_specs=pl.BlockSpec((1, c_pad, 1), lambda b, t: (b, 0, 0)),
        ),
        compiler_params=pltpu.CompilerParams(
            dimension_semantics=("parallel", "arbitrary"),
            vmem_limit_bytes=vmem_limit),
    )(x2)

    # ---- tiny precompute: mean -> 1x1 conv -> sigmoid (single-block call) -----
    pooled_mean = pooled_sum[:, :, 0] * (1.0 / hw)         # (N, Cp) f32
    attn = pl.pallas_call(
        _attn_kernel,
        out_shape=jax.ShapeDtypeStruct((n, c_pad), jnp.float32),
    )(pooled_mean, wt, b2)
    attn = attn.astype(x.dtype).reshape(n, c_pad, 1)

    # ---- pass 2: lane-dense broadcast multiply in x's native dtype ------------
    out_p = pl.pallas_call(
        _scale_kernel,
        out_shape=jax.ShapeDtypeStruct((n, c_pad, hw_pad), x.dtype),
        grid_spec=pltpu.PrefetchScalarGridSpec(
            num_scalar_prefetch=0,
            grid=(n, n_tiles),
            in_specs=[
                pl.BlockSpec((1, c_pad, 1), lambda b, t: (b, 0, 0)),
                pl.BlockSpec((1, c_pad, hw_tile), lambda b, t: (b, 0, t)),
            ],
            out_specs=pl.BlockSpec((1, c_pad, hw_tile), lambda b, t: (b, 0, t)),
        ),
        input_output_aliases={1: 0},   # reuse x's slab for the output
        compiler_params=pltpu.CompilerParams(
            dimension_semantics=("parallel", "parallel"),
            vmem_limit_bytes=vmem_limit),
    )(attn, x2)

    return out_p[:, :c, :hw].reshape(n, c, h, w)


if __name__ == "__main__":
    key = jax.random.PRNGKey(0)
    k1, k2, k3 = jax.random.split(key, 3)

    N, C, H, W = 2, 4, 16, 16
    x = jax.random.normal(k1, (N, C, H, W), dtype=jnp.float32)

    # Deterministic synthetic Conv2d(C, C, 1, 1, 0, bias=True) parameters.
    conv_weight = jax.random.normal(k2, (C, C, 1, 1), dtype=jnp.float32) * 0.1
    conv_bias = jax.random.normal(k3, (C,), dtype=jnp.float32) * 0.1

    fn = jax.jit(channel_attention)
    out = fn(x, conv_weight, conv_bias)
    jax.block_until_ready(out)

    # Pure-JAX reference for sanity.
    pooled = x.mean(axis=(2, 3))                                   # (N, C)
    y = pooled @ conv_weight.reshape(C, C).T + conv_bias           # (N, C)
    ref = x * jax.nn.sigmoid(y)[:, :, None, None]
    assert jnp.allclose(out, ref, atol=1e-5, rtol=1e-5), "mismatch vs reference"

    print("KERNEL_OK")
</pallas_src>

<mosaic_0001>
module attributes {stable_mosaic.version = 11 : i64} {
  func.func @_scale_kernel(%arg0: i32, %arg1: i32, %arg2: memref<1x8x1xf32, #tpu.memory_space<vmem>>, %arg3: memref<1x8x256xf32, #tpu.memory_space<vmem>>, %arg4: memref<1x8x256xf32, #tpu.memory_space<vmem>>) attributes {dimension_semantics = [#tpu.dimension_semantics<parallel>, #tpu.dimension_semantics<parallel>], iteration_bounds = array<i64: 2, 1>, scalar_prefetch = 0 : i64, scratch_operands = 0 : i64, tpu.core_type = #tpu.core_type<tc>, window_params = [{transform_indices = @transform_0, window_bounds = array<i64: 1, 8, 1>}, {transform_indices = @transform_1, window_bounds = array<i64: 1, 8, 256>}, {transform_indices = @transform_2, window_bounds = array<i64: 1, 8, 256>}]} {
    %c0 = arith.constant 0 : index
    %c0_0 = arith.constant 0 : index
    %c0_1 = arith.constant 0 : index
    %0 = vector.load %arg3[%c0, %c0_0, %c0_1] : memref<1x8x256xf32, #tpu.memory_space<vmem>>, vector<1x8x256xf32>
    %c0_2 = arith.constant 0 : index
    %c0_3 = arith.constant 0 : index
    %c0_4 = arith.constant 0 : index
    %1 = vector.load %arg2[%c0_2, %c0_3, %c0_4] : memref<1x8x1xf32, #tpu.memory_space<vmem>>, vector<1x8x1xf32>
    %2 = vector.broadcast %1 : vector<1x8x1xf32> to vector<1x8x256xf32>
    %3 = arith.mulf %0, %2 : vector<1x8x256xf32>
    %c0_5 = arith.constant 0 : index
    %c0_6 = arith.constant 0 : index
    %c0_7 = arith.constant 0 : index
    %4 = vector.load %arg4[%c0_5, %c0_6, %c0_7] : memref<1x8x256xf32, #tpu.memory_space<vmem>>, vector<1x8x256xf32>
    tpu.vector_store %arg4[%c0_5, %c0_6, %c0_7], %3 {strides = array<i32>} : memref<1x8x256xf32, #tpu.memory_space<vmem>>, vector<1x8x256xf32>,
    return
  }
  func.func @transform_0(%arg0: i32, %arg1: i32) -> (i32, i32, i32) {
    %c0_i32 = arith.constant 0 : i32
    %c0_i32_0 = arith.constant 0 : i32
    %c0_i32_1 = arith.constant 0 : i32
    return %arg0, %c0_i32, %c0_i32_0 : i32, i32, i32
  }
  func.func @transform_1(%arg0: i32, %arg1: i32) -> (i32, i32, i32) {
    %c0_i32 = arith.constant 0 : i32
    %c0_i32_0 = arith.constant 0 : i32
    return %arg0, %c0_i32, %arg1 : i32, i32, i32
  }
  func.func @transform_2(%arg0: i32, %arg1: i32) -> (i32, i32, i32) {
    %c0_i32 = arith.constant 0 : i32
    %c0_i32_0 = arith.constant 0 : i32
    return %arg0, %c0_i32, %arg1 : i32, i32, i32
  }
}

module attributes {stable_mosaic.version = 11 : i64} {
  func.func @_attn_kernel(%arg0: memref<2x8xf32, #tpu.memory_space<vmem>>, %arg1: memref<8x8xf32, #tpu.memory_space<vmem>>, %arg2: memref<1x8xf32, #tpu.memory_space<vmem>>, %arg3: memref<2x8xf32, #tpu.memory_space<vmem>>) attributes {dimension_semantics = [], scalar_prefetch = 0 : i64, scratch_operands = 0 : i64, tpu.core_type = #tpu.core_type<tc>} {
    %c0 = arith.constant 0 : index
    %c0_0 = arith.constant 0 : index
    %0 = vector.load %arg0[%c0, %c0_0] : memref<2x8xf32, #tpu.memory_space<vmem>>, vector<2x8xf32>
    %c0_1 = arith.constant 0 : index
    %c0_2 = arith.constant 0 : index
    %1 = vector.load %arg1[%c0_1, %c0_2] : memref<8x8xf32, #tpu.memory_space<vmem>>, vector<8x8xf32>
    %cst = arith.constant dense<0.000000e+00> : vector<2x8xf32>
    %2 = tpu.matmul %0, %1, %cst {dimension_numbers = #tpu.dot_dimension_numbers<[1], [0], [0], [1], [0, 0, 1, 1], [], []>} : vector<2x8xf32>, vector<8x8xf32>, vector<2x8xf32> -> vector<2x8xf32>
    %c0_3 = arith.constant 0 : index
    %c0_4 = arith.constant 0 : index
    %3 = vector.load %arg2[%c0_3, %c0_4] : memref<1x8xf32, #tpu.memory_space<vmem>>, vector<1x8xf32>
    %4 = vector.broadcast %3 : vector<1x8xf32> to vector<2x8xf32>
    %5 = arith.addf %2, %4 : vector<2x8xf32>
    %6 = arith.negf %5 : vector<2x8xf32>
    %7 = math.exp %6 : vector<2x8xf32>
    %cst_5 = arith.constant 1.000000e+00 : f32
    %8 = vector.broadcast %cst_5 : f32 to vector<2x8xf32>
    %9 = arith.addf %8, %7 : vector<2x8xf32>
    %10 = arith.divf %8, %9 : vector<2x8xf32>
    %c0_6 = arith.constant 0 : index
    %c0_7 = arith.constant 0 : index
    %11 = vector.load %arg3[%c0_6, %c0_7] : memref<2x8xf32, #tpu.memory_space<vmem>>, vector<2x8xf32>
    tpu.vector_store %arg3[%c0_6, %c0_7], %10 {strides = array<i32>} : memref<2x8xf32, #tpu.memory_space<vmem>>, vector<2x8xf32>,
    return
  }
}

module attributes {stable_mosaic.version = 11 : i64} {
  func.func @_pool_sum_kernel(%arg0: i32, %arg1: i32, %arg2: memref<1x8x256xf32, #tpu.memory_space<vmem>>, %arg3: memref<1x8x1xf32, #tpu.memory_space<vmem>>) attributes {dimension_semantics = [#tpu.dimension_semantics<parallel>, #tpu.dimension_semantics<arbitrary>], iteration_bounds = array<i64: 2, 1>, scalar_prefetch = 0 : i64, scratch_operands = 0 : i64, tpu.core_type = #tpu.core_type<tc>, window_params = [{transform_indices = @transform_0, window_bounds = array<i64: 1, 8, 256>}, {transform_indices = @transform_1, window_bounds = array<i64: 1, 8, 1>}]} {
    %c0_i32 = arith.constant 0 : i32
    %0 = arith.cmpi eq, %arg1, %c0_i32 : i32
    %1 = arith.extui %0 : i1 to i32
    %c0_i32_0 = arith.constant 0 : i32
    %2 = arith.cmpi ne, %1, %c0_i32_0 : i32
    scf.if %2 {
      %cst_9 = arith.constant 0.000000e+00 : f32
      %9 = vector.broadcast %cst_9 : f32 to vector<1x8x1xf32>
      %c0_10 = arith.constant 0 : index
      %c0_11 = arith.constant 0 : index
      %c0_12 = arith.constant 0 : index
      %10 = vector.load %arg3[%c0_10, %c0_11, %c0_12] : memref<1x8x1xf32, #tpu.memory_space<vmem>>, vector<1x8x1xf32>
      tpu.vector_store %arg3[%c0_10, %c0_11, %c0_12], %9 {strides = array<i32>} : memref<1x8x1xf32, #tpu.memory_space<vmem>>, vector<1x8x1xf32>,
    } else {
    }
    %c0 = arith.constant 0 : index
    %c0_1 = arith.constant 0 : index
    %c0_2 = arith.constant 0 : index
    %3 = vector.load %arg3[%c0, %c0_1, %c0_2] : memref<1x8x1xf32, #tpu.memory_space<vmem>>, vector<1x8x1xf32>
    %c0_3 = arith.constant 0 : index
    %c0_4 = arith.constant 0 : index
    %c0_5 = arith.constant 0 : index
    %4 = vector.load %arg2[%c0_3, %c0_4, %c0_5] : memref<1x8x256xf32, #tpu.memory_space<vmem>>, vector<1x8x256xf32>
    %cst = arith.constant dense<0.000000e+00> : vector<1x8xf32>
    %5 = vector.multi_reduction <add>, %4, %cst [2] : vector<1x8x256xf32> to vector<1x8xf32>
    %6 = vector.shape_cast %5 : vector<1x8xf32> to vector<1x8x1xf32>
    %7 = arith.addf %3, %6 : vector<1x8x1xf32>
    %c0_6 = arith.constant 0 : index
    %c0_7 = arith.constant 0 : index
    %c0_8 = arith.constant 0 : index
    %8 = vector.load %arg3[%c0_6, %c0_7, %c0_8] : memref<1x8x1xf32, #tpu.memory_space<vmem>>, vector<1x8x1xf32>
    tpu.vector_store %arg3[%c0_6, %c0_7, %c0_8], %7 {strides = array<i32>} : memref<1x8x1xf32, #tpu.memory_space<vmem>>, vector<1x8x1xf32>,
    return
  }
  func.func @transform_0(%arg0: i32, %arg1: i32) -> (i32, i32, i32) {
    %c0_i32 = arith.constant 0 : i32
    %c0_i32_0 = arith.constant 0 : i32
    return %arg0, %c0_i32, %arg1 : i32, i32, i32
  }
  func.func @transform_1(%arg0: i32, %arg1: i32) -> (i32, i32, i32) {
    %c0_i32 = arith.constant 0 : i32
    %c0_i32_0 = arith.constant 0 : i32
    %c0_i32_1 = arith.constant 0 : i32
    return %arg0, %c0_i32, %c0_i32_0 : i32, i32, i32
  }
}

</mosaic_0001>

<bundles_post_ra>
// kernel: channel_attention.5
= control target key start
LH: loop header
LB: loop body
LE: loop exit
PB: predicated region body
PF: predicated region fallthrough
CT: control target
= control target key end

     0   :  { %s391_s9 = smov 0   ;;  %s393_s10 = smov 0   ;;  %s424_s0 = inlined_call_operand.vmem [shape: f32[2,8,1], index: 0, kind: input, shape index: {}]   ;;  %s425_s1 = inlined_call_operand.vmem [shape: f32[2,8,256], index: 1, kind: input, shape index: {}, may-alias: {1,2}]   ;;  %s426_s2 = inlined_call_operand.vmem [shape: f32[2,8,256], index: 2, kind: output, shape index: {}, may-alias: {1,2}]  }
   0x1   :  { %s395_s11 = smov 0  }
   0x2 LB: > { %s24_s12 = sadd.s32 1, %s369_s10  ;;  %p315_p0 = scmp.ge.s32.totalorder %s373_s11, 1  ;;  %s373_s11 = sphi %s395_s11, %s12_s11   ;;  %s369_s10 = sphi %s393_s10, %s428_s10   ;;  %s365_s9 = sphi %s391_s9, %s427_s9  }
   0x3   : > { %p26_p1 = scmp.ge.s32.totalorder %s24_s12, 2  ;;  %p142_p2 = scmp.lt.s32.totalorder %s373_s11, 3 }
   0x5   : > { %s430_s12 = smov (%p26_p1, %s24_s12), 0  ;;  %p143_p3 = pnand %p315_p0, %p142_p2 }
   0x6   : > { %p176_p4 = scmp.lt.s32.totalorder (!%p143_p3), %s365_s9, 1 }
   0x7   : > { %146 = sbr.rel (%p143_p3) target bundleno = 143 (0x8f), region = 28 }
   0xc   : > { %v375_v0 = vmov 0   ;;  %s432_s9 = smov (!%p176_p4, %s365_s9), 1 }
   0xd   : > { %350 = vset.pattern.permute.xlu0 %v375_v0  ;;  %s316_s13 = sshll.u32 %s432_s9, 3  ;;  %s323_s17 = sshll.u32 %s432_s9, 4 }
   0xe   : > { %s179_s16 = scalar_lea.vmem %s424_s0, %s316_s13  ;;  %s188_s20 = scalar_lea.vmem %s425_s1, %s323_s17 }
   0xf   : > { %v202_v1 = vld [vmem:[%s179_s16] sm:$0xff]  ;;  %v201_v3 = vld [vmem:[%s188_s20 + $0x8] sm:$0xff]  ;;  %s198_s23 = scalar_lea.vmem %s426_s2, %s323_s17 }
  0x10   : > { %205 = vperm.xlu0 %350, %v202_v1   ;;  %v200_v2 = vld [vmem:[%s188_s20] sm:$0xff] }
  0x8b   : > { %v206_v4 = vpop.permute.xlu0 %205 }
  0x8c   : > { %v208_v5 = vmul.f32 %v206_v4, %v200_v2  ;;  %v209_v6 = vmul.f32 %v206_v4, %v201_v3 }
  0x8e   : > { %210 = vst [vmem:[%s198_s23] sm:$0xff] %v208_v5  ;;  %211 = vst [vmem:[%s198_s23 + $0x8] sm:$0xff] %v209_v6 }
  0x8f PF: > { %s12_s11 = sadd.s32 1, %s373_s11   ;;  %s427_s9 = smov %s369_s10 }
  0x90   : > { %p9_p5 = scmp.ge.s32.totalorder %s12_s11, 4   ;;  %s428_s10 = smov %s430_s12 }
  0x92   :  { %11 = sbr.rel (!%p9_p5) target bundleno = 2 (0x2), region = 61 }

// kernel: channel_attention.3
= control target key start
LH: loop header
LB: loop body
LE: loop exit
PB: predicated region body
PF: predicated region fallthrough
CT: control target
= control target key end

     0   :  { %s296_s6 = smov 0   ;;  %s298_s7 = smov 0   ;;  %s322_s0 = inlined_call_operand.vmem [shape: f32[2,8,256], index: 0, kind: input, shape index: {}]   ;;  %s323_s1 = inlined_call_operand.vmem [shape: f32[2,8,1], index: 1, kind: output, shape index: {}]  }
   0x1   :  { %s300_s8 = smov 0  }
   0x2 LB: > { %s23_s9 = sadd.s32 1, %s279_s7  ;;  %p229_p0 = scmp.ge.s32.totalorder %s283_s8, 1  ;;  %s283_s8 = sphi %s300_s8, %s11_s8   ;;  %s279_s7 = sphi %s298_s7, %s325_s7   ;;  %s275_s6 = sphi %s296_s6, %s324_s6  }
   0x3   : > { %p25_p1 = scmp.ge.s32.totalorder %s23_s9, 2  ;;  %p106_p2 = scmp.lt.s32.totalorder %s283_s8, 3 }
   0x5   : > { %s327_s9 = smov (%p25_p1, %s23_s9), 0  ;;  %p107_p3 = pnand %p229_p0, %p106_p2 }
   0x6   : > { %p130_p4 = scmp.lt.s32.totalorder (!%p107_p3), %s275_s6, 1 }
   0x7   : > { %110 = sbr.rel (%p107_p3) target bundleno = 159 (0x9f), region = 24 }
   0xc   : > { %s329_s6 = smov (!%p130_p4, %s275_s6), 1  ;;  %vm147_vm0 = vcmask 7168   ;;  %v285_v2 = vmov 0.0  }
   0xd   : > { %s235_s10 = sshll.u32 %s329_s6, 4  ;;  %s232_s11 = sshll.u32 %s329_s6, 3 }
   0xe   : > { %s137_s14 = scalar_lea.vmem %s322_s0, %s235_s10  ;;  %s142_s17 = scalar_lea.vmem %s323_s1, %s232_s11 }
   0xf   : > { %v150_v0 = vld [vmem:[%s137_s14] sm:$0xff]  ;;  %v151_v1 = vld [vmem:[%s137_s14 + $0x8] sm:$0xff]  ;;  %148 = vst.msk [vmem:[%s142_s17] sm:$0xff] %vm147_vm0, %v285_v2 }
  0x10   : > { %v152_v3 = vadd.f32 %v151_v1, %v150_v0 }
  0x12   : > { %153 = vadd.xlane.f32.xlu0 %v152_v3 }
  0x16   : > { %v149_v4 = vld [vmem:[%s142_s17] sm:$0xff] }
  0x9b   : > { %v154_v5 = vpop.xlane.xlu0 %153 }
  0x9c   : > { %v155_v6 = vadd.f32 %v154_v5, %v149_v4 }
  0x9e   : > { %157 = vst.msk [vmem:[%s142_s17] sm:$0xff] %vm147_vm0, %v155_v6 }
  0x9f PF: > { %s11_s8 = sadd.s32 1, %s283_s8   ;;  %s324_s6 = smov %s279_s7 }
  0xa0   : > { %p8_p5 = scmp.ge.s32.totalorder %s11_s8, 4   ;;  %s325_s7 = smov %s327_s9 }
  0xa2   :  { %10 = sbr.rel (!%p8_p5) target bundleno = 2 (0x2), region = 58 }

// kernel: channel_attention.4
= control target key start
LH: loop header
LB: loop body
LE: loop exit
PB: predicated region body
PF: predicated region fallthrough
CT: control target
= control target key end

     0   :  { %vm23_vm0 = vcmask 64512   ;;  %v125_v0 = vmov 0.0   ;;  %vm126_vm1 = vmmov 0   ;;  %vm103_vm2 = vcmask 58368   ;;  %s159_s1 = inlined_call_operand.vmem [shape: f32[8,8], index: 1, kind: input, shape index: {}]   ;;  %s160_s0 = inlined_call_operand.vmem [shape: f32[2,8], index: 0, kind: input, shape index: {}]   ;;  %s161_s2 = inlined_call_operand.vmem [shape: f32[1,8], index: 2, kind: input, shape index: {}]   ;;  %s162_s3 = inlined_call_operand.vmem [shape: f32[2,8], index: 3, kind: output, shape index: {}]  }
   0x1   :  { %114 = vmatprep.subr.mxu0 %v125_v0  ;;  %v15_v1 = vld [vmem:[%s159_s1] sm:$0xff]  ;;  %116 = vmatprep.mubr.msk.f32.mxu0 %vm126_vm1, %v125_v0 }
   0x2   :  { %v14_v2 = vld [vmem:[%s160_s0] sm:$0x3]  ;;  %115 = vmatpush3.msra.mxu0 %v15_v1 }
   0x3   :  { %117 = vmatmul.mubr.msk.f32.vlgmr.msra.gmra.mxu0 %vm23_vm0, %v14_v2  ;;  %v109_v3 = vld [vmem:[%s161_s2] ss:$0 sm:$0xff] }
  0xc3   :  { %v93_v4 = vpop.f32.mrf.mxu0 }
  0xc4   :  { %v94_v5 = vadd.f32 %v109_v3, %v93_v4 }
  0xc5   :  { %v118_v6 = vpop.f32.mrf.mxu0 }
  0xc6   :  { %v111_v7 = vmul.f32 -1.442695, %v94_v5 }
  0xc8   :  { %121 = vpow2.f32 %v111_v7 }
  0xd5   :  { %v122_v8 = vpop.eup %121 }
  0xd6   :  { %v100_v9 = vadd.f32 1.0, %v122_v8 }
  0xd8   :  { %123 = vrcp.f32 %v100_v9 }
  0xe5   :  { %v124_v10 = vpop.eup %123 }
  0xe6   :  { %104 = vst.msk [vmem:[%s162_s3] sm:$0x3] %vm103_vm2, %v124_v10 }

</bundles_post_ra>
